<compile_context>
chip_gen: v6e
topology: v6e:2x2x1
jax: 0.10.0
libtpu: 0.0.40
codegen_flags: <defaults>
</compile_context>

<pallas_src>
import jax
import jax.numpy as jnp
from jax.experimental import pallas as pl
from jax.experimental.pallas import tpu as pltpu


def _alias_noop_kernel(x_ref, o_ref):
    # Output HBM buffer is aliased to the input buffer, so it already contains the
    # result.  Touch pins a read+write ordering dependency on the aliased output so it
    # materializes, while moving zero bytes inside the kernel.
    del x_ref
    pltpu.touch(o_ref)


def _hbm_copy_kernel(x_ref, o_ref, sem):
    # Single direct HBM->HBM DMA of the whole tensor: no VMEM staging, no grid.
    cp = pltpu.make_async_copy(x_ref, o_ref, sem)
    cp.start()
    cp.wait()


def _identity_aliased(data: jax.Array) -> jax.Array:
    return pl.pallas_call(
        _alias_noop_kernel,
        out_shape=jax.ShapeDtypeStruct(data.shape, data.dtype),
        in_specs=[pl.BlockSpec(memory_space=pl.ANY)],
        out_specs=pl.BlockSpec(memory_space=pl.ANY),
        # Output shares the input HBM buffer: the identity is free when `data` is
        # donatable; otherwise XLA inserts exactly one copy outside the kernel.
        input_output_aliases={0: 0},
    )(data)


def _identity_hbm_dma(data: jax.Array) -> jax.Array:
    return pl.pallas_call(
        _hbm_copy_kernel,
        out_shape=jax.ShapeDtypeStruct(data.shape, data.dtype),
        in_specs=[pl.BlockSpec(memory_space=pl.ANY)],
        out_specs=pl.BlockSpec(memory_space=pl.ANY),
        scratch_shapes=[pltpu.SemaphoreType.DMA],
    )(data)


def g_lstm_forward(data: jax.Array, g=None) -> jax.Array:
    """Pallas implementation of G_LSTM.forward (identity on `data`).

    `g` (the LIGN graph) contributes no numeric state to the output; it is accepted
    only for signature parity and ignored.
    """
    del g
    if data.size == 0:
        return data  # nothing to move

    try:
        out = _identity_aliased(data)
        return jax.block_until_ready(out)
    except Exception:
        # Fallback: physically materialize the output with one HBM->HBM DMA.
        out = _identity_hbm_dma(data)
        return jax.block_until_ready(out)


if __name__ == "__main__":
    key = jax.random.PRNGKey(0)
    # Small NCHW-style node-feature tensor consistent with graph-node data.
    x = jax.random.normal(key, (2, 4, 16, 16), dtype=jnp.float32)

    y = g_lstm_forward(x)
    y = jax.block_until_ready(y)

    # Reference: G_LSTM.forward is an exact identity on `data`.
    assert y.shape == x.shape and y.dtype == x.dtype
    assert jnp.array_equal(y, x), "G_LSTM forward should be an exact identity"

    print("KERNEL_OK")
</pallas_src>

<mosaic_0001>
module attributes {stable_mosaic.version = 11 : i64} {
  func.func @_alias_noop_kernel(%arg0: memref<2x4x16x16xf32, #tpu.memory_space<any>>, %arg1: memref<2x4x16x16xf32, #tpu.memory_space<any>>) attributes {dimension_semantics = [], scalar_prefetch = 0 : i64, scratch_operands = 0 : i64, tpu.core_type = #tpu.core_type<tc>} {
    return
  }
}

module attributes {stable_mosaic.version = 11 : i64} {
  func.func @_hbm_copy_kernel(%arg0: memref<2x4x16x16xf32, #tpu.memory_space<any>>, %arg1: memref<2x4x16x16xf32, #tpu.memory_space<any>>, %arg2: memref<!tpu.dma_semaphore, #tpu.memory_space<semaphore_mem>>) attributes {dimension_semantics = [], scalar_prefetch = 0 : i64, scratch_operands = 1 : i64, tpu.core_type = #tpu.core_type<tc>} {
    tpu.enqueue_dma source(%arg0 : memref<2x4x16x16xf32, #tpu.memory_space<any>>) target(%arg1 : memref<2x4x16x16xf32, #tpu.memory_space<any>>) target_semaphore(%arg2 : memref<!tpu.dma_semaphore, #tpu.memory_space<semaphore_mem>>)
    tpu.wait_dma2 semaphore(%arg2 : memref<!tpu.dma_semaphore, #tpu.memory_space<semaphore_mem>>) src(%arg0 : memref<2x4x16x16xf32, #tpu.memory_space<any>>) dst(%arg1 : memref<2x4x16x16xf32, #tpu.memory_space<any>>)
    return
  }
}

</mosaic_0001>

<bundles_post_ra>
// kernel: tpu_custom_call.1
= control target key start
LH: loop header
LB: loop body
LE: loop exit
PB: predicated region body
PF: predicated region fallthrough
CT: control target
= control target key end

     0   :  { %s16_s0 = inlined_call_operand.hbm [shape: f32[2,4,16,16], index: 0, kind: input, shape index: {}, may-alias: {0,1}]   ;;  %s17_s1 = inlined_call_operand.hbm [shape: f32[2,4,16,16], index: 1, kind: output, shape index: {}, may-alias: {0,1}]  }

// kernel: tpu_custom_call.1
= control target key start
LH: loop header
LB: loop body
LE: loop exit
PB: predicated region body
PF: predicated region fallthrough
CT: control target
= control target key end

     0   :  { %s30_s6 = smov [#allocation2]   ;;  %s31_s7 = smov 131072   ;;  %s49_s0 = inlined_call_operand.hbm [shape: f32[2,4,16,16], index: 0, kind: input, shape index: {}]   ;;  %s50_s1 = inlined_call_operand.hbm [shape: f32[2,4,16,16], index: 1, kind: output, shape index: {}]  }
   0x1   :  { %s32_s8 = smov 0  }
   0x2   :  { %12 = dma.general %s49_s0, 2048, %s50_s1, %s30_s6, %s31_s7, [#allocation4], %s32_s8, 0  }
   0x3   :  { %28 = dma.done.wait [#allocation2], 2048 }
   0x4   :  { %29 = vsyncadd [#allocation2], 4294965248 }
   0x5   :  { %18 = vsyncmov [#allocation2] }
   0x8   :  { %s19_s13 = vpop.sfrf %18 }
   0x9   :  { %p24_p0 = scmp.ne.s32.totalorder %s19_s13, 0 }
   0xb   :  { %23 = shalt.err (%p24_p0)  }

</bundles_post_ra>
